<compile_context>
chip_gen: v7x
topology: tpu7x:2x2x1
jax: 0.10.0
libtpu: 0.0.40
codegen_flags: <defaults>
</compile_context>

<pallas_src>
import functools

import jax
import jax.numpy as jnp
from jax.experimental import pallas as pl
from jax.experimental.pallas import tpu as pltpu


def _softmax_rows_kernel(x_ref, o_ref):
    """Row-wise softmax over the last (lane) dimension of a (TB, HW) tile."""
    x = x_ref[...].astype(jnp.float32)
    m = jnp.max(x, axis=-1, keepdims=True)          # XLU lane-reduce
    e = jnp.exp(x - m)                               # EUP
    s = jnp.sum(e, axis=-1, keepdims=True)           # XLU lane-reduce
    o_ref[...] = (e / s).astype(o_ref.dtype)          # exact normalization


def _pick_row_tile(rows, hw, itemsize=4, vmem_budget_bytes=8 * 1024 * 1024):
    """Pick a row-tile size that comfortably fits VMEM on all generations.

    ~4 live buffers (double-buffered input + double-buffered output) of
    (tb, hw) must fit the budget; 8 MiB leaves large headroom under the
    v7x 32 MiB scoped default and the v5e/v6e 16/32 MiB defaults.
    """
    bytes_per_row = max(1, hw * itemsize)
    max_tb = vmem_budget_bytes // (4 * bytes_per_row)
    max_tb = max(8, (max_tb // 8) * 8)       # sublane-aligned
    if rows <= max_tb:
        return rows                          # full-extent block: always legal
    return max(8, min(2048, max_tb))         # multiple of 8 for tiled blocks


@functools.partial(jax.jit, static_argnames=("channels", "height", "width"))
def softmax_image(x, *, channels, height, width):
    """Equivalent of SoftmaxImage(channels, height, width).forward(x)."""
    n = x.shape[0]
    hw = height * width
    rows = n * channels

    # Glue: reshape only (layout plumbing), softmax in-kernel.
    x2 = x.reshape(rows, hw)

    tb = _pick_row_tile(rows, hw, itemsize=x2.dtype.itemsize)
    grid = (pl.cdiv(rows, tb),)

    out = pl.pallas_call(
        _softmax_rows_kernel,
        out_shape=jax.ShapeDtypeStruct((rows, hw), x.dtype),
        grid=grid,
        in_specs=[pl.BlockSpec((tb, hw), lambda i: (i, 0))],
        out_specs=pl.BlockSpec((tb, hw), lambda i: (i, 0)),
        compiler_params=pltpu.CompilerParams(
            dimension_semantics=("parallel",)),
    )(x2)

    return out.reshape(n, channels, height, width)


def _reference_forward(x, channels, height, width):
    n = x.shape[0]
    x2 = x.reshape(n, channels, height * width)
    x2 = jax.nn.softmax(x2, axis=2)
    return x2.reshape(n, channels, height, width)


if __name__ == "__main__":
    # Small shapes consistent with the module's forward: (N, C, H, W).
    batch, channels, height, width = 2, 4, 16, 16

    key = jax.random.PRNGKey(0)
    x = jax.random.normal(key, (batch, channels, height, width), jnp.float32)

    out = softmax_image(x, channels=channels, height=height, width=width)
    out = jax.block_until_ready(out)

    ref = _reference_forward(x, channels, height, width)

    assert out.shape == (batch, channels, height, width)
    assert jnp.allclose(out, ref, atol=1e-5, rtol=1e-5)
    row_sums = jnp.sum(out.reshape(batch, channels, -1), axis=-1)
    assert jnp.allclose(row_sums, 1.0, atol=1e-4)

    print("KERNEL_OK")
</pallas_src>

<mosaic_0001>
module attributes {stable_mosaic.version = 11 : i64} {
  func.func @_softmax_rows_kernel(%arg0: i32, %arg1: memref<8x256xf32, #tpu.memory_space<vmem>>, %arg2: memref<8x256xf32, #tpu.memory_space<vmem>>) attributes {dimension_semantics = [#tpu.dimension_semantics<parallel>], iteration_bounds = array<i64: 1>, scalar_prefetch = 0 : i64, scratch_operands = 0 : i64, tpu.core_type = #tpu.core_type<tc>, window_params = [{transform_indices = @transform_0, window_bounds = array<i64: 8, 256>}, {transform_indices = @transform_1, window_bounds = array<i64: 8, 256>}]} {
    %c0 = arith.constant 0 : index
    %c0_0 = arith.constant 0 : index
    %0 = vector.load %arg1[%c0, %c0_0] : memref<8x256xf32, #tpu.memory_space<vmem>>, vector<8x256xf32>
    %cst = arith.constant dense<0xFF800000> : vector<8xf32>
    %1 = vector.multi_reduction <maximumf>, %0, %cst [1] : vector<8x256xf32> to vector<8xf32>
    %2 = vector.shape_cast %1 : vector<8xf32> to vector<8x1xf32>
    %3 = vector.broadcast %2 : vector<8x1xf32> to vector<8x256xf32>
    %4 = arith.subf %0, %3 : vector<8x256xf32>
    %5 = math.exp %4 : vector<8x256xf32>
    %cst_1 = arith.constant dense<0.000000e+00> : vector<8xf32>
    %6 = vector.multi_reduction <add>, %5, %cst_1 [1] : vector<8x256xf32> to vector<8xf32>
    %7 = vector.shape_cast %6 : vector<8xf32> to vector<8x1xf32>
    %8 = vector.broadcast %7 : vector<8x1xf32> to vector<8x256xf32>
    %9 = arith.divf %5, %8 : vector<8x256xf32>
    %c0_2 = arith.constant 0 : index
    %c0_3 = arith.constant 0 : index
    %10 = vector.load %arg2[%c0_2, %c0_3] : memref<8x256xf32, #tpu.memory_space<vmem>>, vector<8x256xf32>
    tpu.vector_store %arg2[%c0_2, %c0_3], %9 {strides = array<i32>} : memref<8x256xf32, #tpu.memory_space<vmem>>, vector<8x256xf32>,
    return
  }
  func.func @transform_0(%arg0: i32) -> (i32, i32) {
    %c0_i32 = arith.constant 0 : i32
    %c0_i32_0 = arith.constant 0 : i32
    return %arg0, %c0_i32 : i32, i32
  }
  func.func @transform_1(%arg0: i32) -> (i32, i32) {
    %c0_i32 = arith.constant 0 : i32
    %c0_i32_0 = arith.constant 0 : i32
    return %arg0, %c0_i32 : i32, i32
  }
}

</mosaic_0001>

<bundles_post_ra>
// kernel: softmax_image.1
= control target key start
LH: loop header
LB: loop body
LE: loop exit
PB: predicated region body
PF: predicated region fallthrough
CT: control target
= control target key end

     0   :  { %s59_s0 = inlined_call_operand.vmem [shape: f32[8,256], index: 0, kind: input, shape index: {}]   ;;  %s60_s1 = inlined_call_operand.vmem [shape: f32[8,256], index: 1, kind: output, shape index: {}]  }
   0x1   :  { %v8_v0 = vld [vmem:[%s59_s0] sm:$0xff]  ;;  %v9_v1 = vld [vmem:[%s59_s0 + $0x8] sm:$0xff] }
   0x2   :  { %v10_v2 = vmax.f32 %v8_v0, %v9_v1 }
   0x4   :  { %11 = vmax.xlane.f32.xlu0 %v10_v2 }
  0x91   :  { %v12_v3 = vpop.xlane.xlu0 %11 }
  0x92   :  { %v13_v4 = vsub.f32 %v8_v0, %v12_v3  ;;  %v14_v5 = vsub.f32 %v9_v1, %v12_v3 }
  0x94   :  { %v15_v6 = vmul.f32 1.442695, %v13_v4  ;;  %v17_v7 = vmul.f32 1.442695, %v14_v5 }
  0x96   :  { %31 = vpow2.f32 %v15_v6 }
  0x97   :  { %33 = vpow2.f32 %v17_v7 }
  0xa0   :  { %v32_v8 = vpop.eup %31 }
  0xa1   :  { %v34_v9 = vpop.eup %33 }
  0xa2   :  { %v19_v10 = vadd.f32 %v34_v9, %v32_v8 }
  0xa4   :  { %20 = vadd.xlane.f32.xlu0 %v19_v10 }
 0x131   :  { %v21_v11 = vpop.xlane.xlu0 %20 }
 0x132   :  { %35 = vrcp.f32 %v21_v11 }
 0x13c   :  { %v36_v12 = vpop.eup %35 }
 0x13d   :  { %v23_v13 = vmul.f32 %v36_v12, %v32_v8  ;;  %v24_v14 = vmul.f32 %v36_v12, %v34_v9 }
 0x13f   :  { %25 = vst [vmem:[%s60_s1] sm:$0xff] %v23_v13  ;;  %26 = vst [vmem:[%s60_s1 + $0x8] sm:$0xff] %v24_v14 }

</bundles_post_ra>
